<compile_context>
chip_gen: v5e
topology: v5e:2x2
jax: 0.10.0
libtpu: 0.0.40
codegen_flags: <defaults>
</compile_context>

<pallas_src>
import functools
import math

import jax
import jax.numpy as jnp
from jax.experimental import pallas as pl
from jax.experimental.pallas import tpu as pltpu


def _round_up(x, m):
    return -(-x // m) * m


def _relpos_kernel(table_ref, klocal_ref, out_ref, *, tile_q, tile_k, clip):
    """One (q, k) tile of R[q, k, :] = table[clip(k - q, -c, c) + c, :].

    table_ref : (2c+1, tile_k*E) table rows tiled along key positions; same
                block for every grid step, so it stays resident in VMEM.
    klocal_ref: (1, tile_k*E) column -> local key index (col // E), precomputed
                so the kernel performs no integer division.
    out_ref   : (tile_q, tile_k*E) lane-dense output block.
    """
    num_emb = 2 * clip + 1
    q0 = pl.program_id(0) * tile_q
    k0 = pl.program_id(1) * tile_k

    # d = (k - q) + clip ; the selected table row is clamp(d, 0, 2*clip).
    d_off = k0 - q0 + clip
    d_max = d_off + (tile_k - 1)      # max d anywhere in this tile
    d_min = d_off - (tile_q - 1)      # min d anywhere in this tile

    def row(m):                       # (1, lanes) view of table row m
        return table_ref[pl.ds(m, 1), :]

    def bcast(m):                     # sublane-broadcast row m to the block
        return jnp.broadcast_to(row(m), out_ref.shape).astype(out_ref.dtype)

    # Tile entirely left of the band: every distance clips to -c -> row 0.
    @pl.when(d_max <= 0)
    def _():
        out_ref[...] = bcast(0)

    # Tile entirely right of the band: every distance clips to +c -> row 2c.
    @pl.when(d_min >= 2 * clip)
    def _():
        out_ref[...] = bcast(2 * clip)

    # Band-intersecting tile: 2c compares + 2c selects (pure VPU work).
    @pl.when(jnp.logical_and(d_max > 0, d_min < 2 * clip))
    def _():
        r = jax.lax.broadcasted_iota(jnp.int32, (tile_q, 1), 0)
        d = (klocal_ref[...] + d_off) - r          # (tile_q, lanes) int32
        acc = jnp.broadcast_to(row(0), out_ref.shape)
        for m in range(1, num_emb):                # largest m <= d wins
            acc = jnp.where(d >= m, row(m), acc)
        out_ref[...] = acc.astype(out_ref.dtype)


def _pick_tiles(length_q, length_k, emb_len, *, dtype_bytes,
                block_budget_bytes=2 << 20, target_lanes=4096):
    """Choose (tile_q, tile_k, Lq_pad, Lk_pad).

    Constraints: tile_q is a multiple of 8; tile_k*E is a multiple of 128
    unless the k dimension is not tiled at all (single full-lane block).
    The output block is kept near `block_budget_bytes` (~2 MiB) to amortize
    per-grid-step overhead while staying well inside scoped VMEM on all chips.
    """
    full_lanes = length_k * emb_len
    if full_lanes <= 2 * target_lanes:
        tile_k = length_k                       # single k block, full lane extent
        lk_pad = length_k
    else:
        g = 128 // math.gcd(emb_len, 128)       # smallest tile_k with 128-lane alignment
        tile_k = max(g, (target_lanes // emb_len) // g * g)
        lk_pad = _round_up(length_k, tile_k)
    lanes = tile_k * emb_len

    lq_pad8 = _round_up(length_q, 8)
    max_q = max(8, (block_budget_bytes // (lanes * dtype_bytes)) // 8 * 8)
    tile_q = min(max_q, lq_pad8, 1024)
    n_q = -(-lq_pad8 // tile_q)
    tile_q = _round_up(-(-lq_pad8 // n_q), 8)   # balance tiles, keep multiple of 8
    lq_pad = n_q * tile_q
    return tile_q, tile_k, lq_pad, lk_pad


def relative_position(embeddings_table, length_q, length_k, clipping_threshold,
                      *, tile_q=None, tile_k=None, out_dtype=None):
    """Pallas equivalent of RelativePosition.forward(length_q, length_k)."""
    num_emb, emb_len = embeddings_table.shape
    assert num_emb == 2 * clipping_threshold + 1
    out_dtype = embeddings_table.dtype if out_dtype is None else out_dtype
    dtype_bytes = jnp.dtype(out_dtype).itemsize

    auto_tq, auto_tk, _, _ = _pick_tiles(length_q, length_k, emb_len,
                                         dtype_bytes=dtype_bytes)
    tile_q = auto_tq if tile_q is None else tile_q
    tile_k = auto_tk if tile_k is None else tile_k
    lq_pad = _round_up(length_q, tile_q)
    lk_pad = _round_up(length_k, tile_k)
    lanes = tile_k * emb_len

    # (8, 128) block constraints.
    assert tile_q % 8 == 0 or tile_q == lq_pad, (tile_q, lq_pad)
    assert lanes % 128 == 0 or tile_k == lk_pad, (tile_k, emb_len, lk_pad)

    # Small resident inputs: table tiled along one k-tile only, plus the
    # per-column local key index (avoids in-kernel integer division).
    table_tiled = jnp.tile(embeddings_table, (1, tile_k))                  # (2c+1, lanes)
    klocal = jnp.repeat(jnp.arange(tile_k, dtype=jnp.int32), emb_len)[None, :]  # (1, lanes)

    grid = (lq_pad // tile_q, lk_pad // tile_k)

    kernel = functools.partial(_relpos_kernel, tile_q=tile_q, tile_k=tile_k,
                               clip=clipping_threshold)

    out_block_bytes = tile_q * lanes * dtype_bytes
    table_bytes = num_emb * lanes * dtype_bytes
    klocal_bytes = lanes * 4
    band_k = min(lk_pad, tile_q + tile_k + 2 * clipping_threshold)

    out2d = pl.pallas_call(
        kernel,
        out_shape=jax.ShapeDtypeStruct((lq_pad, lk_pad * emb_len), out_dtype),
        grid=grid,
        in_specs=[
            pl.BlockSpec((num_emb, lanes), lambda i, j: (0, 0)),
            pl.BlockSpec((1, lanes), lambda i, j: (0, 0)),
        ],
        out_specs=pl.BlockSpec((tile_q, lanes), lambda i, j: (i, j)),
        compiler_params=pltpu.CompilerParams(
            dimension_semantics=("parallel", "parallel"),
            vmem_limit_bytes=32 * 1024 * 1024),
        cost_estimate=pl.CostEstimate(
            flops=int(3 * num_emb * lq_pad * band_k * emb_len),
            transcendentals=0,
            bytes_accessed=int(lq_pad * lk_pad * emb_len * dtype_bytes
                               + grid[0] * grid[1] * (table_bytes + klocal_bytes))),
    )(table_tiled, klocal)

    # (Lq_pad, Lk_pad*E) -> (Lq_pad, Lk_pad, E): byte-identical reshape,
    # then slice away any tile padding.
    out = out2d.reshape(lq_pad, lk_pad, emb_len)
    if lq_pad != length_q or lk_pad != length_k:
        out = out[:length_q, :length_k]
    return out


def _reference(embeddings_table, length_q, length_k, clip):
    """Plain-JAX replica of the PyTorch forward, for verification."""
    rq = jnp.arange(length_q)
    rk = jnp.arange(length_k)
    dist = rk[None, :] - rq[:, None]
    idx = jnp.clip(dist, -clip, clip) + clip
    return jnp.take(embeddings_table, idx, axis=0)


if __name__ == "__main__":
    # Module config: embedding_len=32, clipping_threshold=4 -> 9 embeddings.
    embedding_len = 32
    clipping_threshold = 4
    num_embeddings = 2 * clipping_threshold + 1

    # nn.Embedding default init ~ N(0, 1); deterministic synthetic weights here.
    key = jax.random.PRNGKey(0)
    embeddings_table = jax.random.normal(
        key, (num_embeddings, embedding_len), dtype=jnp.float32)

    # Case 1: module-sized shapes, auto-picked tiles (single band tile).
    out = relative_position(embeddings_table, 8, 8, clipping_threshold)
    out = jax.block_until_ready(out)
    ref = _reference(embeddings_table, 8, 8, clipping_threshold)
    assert out.shape == (8, 8, embedding_len)
    assert out.dtype == embeddings_table.dtype
    assert jnp.array_equal(out, ref)

    # Case 2: explicit small tiles -> exercises below-band / band / above-band
    # pl.when branches and the 2-D (q, k) grid.
    out2 = relative_position(embeddings_table, 32, 48, clipping_threshold,
                             tile_q=8, tile_k=4)
    out2 = jax.block_until_ready(out2)
    ref2 = _reference(embeddings_table, 32, 48, clipping_threshold)
    assert out2.shape == (32, 48, embedding_len)
    assert jnp.array_equal(out2, ref2)

    # Case 3: lengths not divisible by the tiles -> padding + slice path.
    out3 = relative_position(embeddings_table, 20, 12, clipping_threshold,
                             tile_q=8, tile_k=4)
    out3 = jax.block_until_ready(out3)
    ref3 = _reference(embeddings_table, 20, 12, clipping_threshold)
    assert out3.shape == (20, 12, embedding_len)
    assert jnp.array_equal(out3, ref3)

    print("KERNEL_OK")
</pallas_src>

<mosaic_0001>
module attributes {stable_mosaic.version = 11 : i64} {
  func.func @_relpos_kernel(%arg0: i32, %arg1: i32, %arg2: memref<9x256xf32, #tpu.memory_space<vmem>>, %arg3: memref<1x256xi32, #tpu.memory_space<vmem>>, %arg4: memref<8x256xf32, #tpu.memory_space<vmem>>) attributes {dimension_semantics = [#tpu.dimension_semantics<parallel>, #tpu.dimension_semantics<parallel>], iteration_bounds = array<i64: 1, 1>, scalar_prefetch = 0 : i64, scratch_operands = 0 : i64, tpu.core_type = #tpu.core_type<tc>, window_params = [{pipeline_mode = #tpu.pipeline_mode<synchronous>, transform_indices = @transform_0, window_bounds = array<i64: 9, 256>}, {pipeline_mode = #tpu.pipeline_mode<synchronous>, transform_indices = @transform_1, window_bounds = array<i64: 1, 256>}, {transform_indices = @transform_2, window_bounds = array<i64: 8, 256>}]} {
    %c8_i32 = arith.constant 8 : i32
    %0 = arith.muli %arg0, %c8_i32 : i32
    %c8_i32_0 = arith.constant 8 : i32
    %1 = arith.muli %arg1, %c8_i32_0 : i32
    %2 = arith.subi %1, %0 : i32
    %c4_i32 = arith.constant 4 : i32
    %3 = arith.addi %2, %c4_i32 : i32
    %c7_i32 = arith.constant 7 : i32
    %4 = arith.addi %3, %c7_i32 : i32
    %c7_i32_1 = arith.constant 7 : i32
    %5 = arith.subi %3, %c7_i32_1 : i32
    %c0_i32 = arith.constant 0 : i32
    %6 = arith.cmpi sle, %4, %c0_i32 : i32
    %7 = arith.extui %6 : i1 to i32
    %c0_i32_2 = arith.constant 0 : i32
    %8 = arith.cmpi ne, %7, %c0_i32_2 : i32
    scf.if %8 {
      %c0 = arith.constant 0 : index
      %c0_8 = arith.constant 0 : index
      %17 = vector.load %arg2[%c0, %c0_8] : memref<9x256xf32, #tpu.memory_space<vmem>>, vector<1x256xf32>
      %18 = vector.shape_cast %17 : vector<1x256xf32> to vector<1x256xf32>
      %19 = vector.broadcast %18 : vector<1x256xf32> to vector<8x256xf32>
      %c0_9 = arith.constant 0 : index
      %c0_10 = arith.constant 0 : index
      %20 = vector.load %arg4[%c0_9, %c0_10] : memref<8x256xf32, #tpu.memory_space<vmem>>, vector<8x256xf32>
      tpu.vector_store %arg4[%c0_9, %c0_10], %19 {strides = array<i32>} : memref<8x256xf32, #tpu.memory_space<vmem>>, vector<8x256xf32>,
    } else {
    }
    %c8_i32_3 = arith.constant 8 : i32
    %9 = arith.cmpi sge, %5, %c8_i32_3 : i32
    %10 = arith.extui %9 : i1 to i32
    %c0_i32_4 = arith.constant 0 : i32
    %11 = arith.cmpi ne, %10, %c0_i32_4 : i32
    scf.if %11 {
      %c8 = arith.constant 8 : index
      %c0 = arith.constant 0 : index
      %17 = vector.load %arg2[%c8, %c0] : memref<9x256xf32, #tpu.memory_space<vmem>>, vector<1x256xf32>
      %18 = vector.shape_cast %17 : vector<1x256xf32> to vector<1x256xf32>
      %19 = vector.broadcast %18 : vector<1x256xf32> to vector<8x256xf32>
      %c0_8 = arith.constant 0 : index
      %c0_9 = arith.constant 0 : index
      %20 = vector.load %arg4[%c0_8, %c0_9] : memref<8x256xf32, #tpu.memory_space<vmem>>, vector<8x256xf32>
      tpu.vector_store %arg4[%c0_8, %c0_9], %19 {strides = array<i32>} : memref<8x256xf32, #tpu.memory_space<vmem>>, vector<8x256xf32>,
    } else {
    }
    %c0_i32_5 = arith.constant 0 : i32
    %12 = arith.cmpi sgt, %4, %c0_i32_5 : i32
    %c8_i32_6 = arith.constant 8 : i32
    %13 = arith.cmpi slt, %5, %c8_i32_6 : i32
    %14 = arith.andi %12, %13 : i1
    %15 = arith.extui %14 : i1 to i32
    %c0_i32_7 = arith.constant 0 : i32
    %16 = arith.cmpi ne, %15, %c0_i32_7 : i32
    scf.if %16 {
      %17 = tpu.iota {dimensions = array<i32: 0>} : vector<8x1xi32>
      %c0 = arith.constant 0 : index
      %c0_8 = arith.constant 0 : index
      %18 = vector.load %arg3[%c0, %c0_8] : memref<1x256xi32, #tpu.memory_space<vmem>>, vector<1x256xi32>
      %19 = vector.broadcast %3 : i32 to vector<1x256xi32>
      %20 = arith.addi %18, %19 : vector<1x256xi32>
      %21 = vector.broadcast %20 : vector<1x256xi32> to vector<8x256xi32>
      %22 = vector.broadcast %17 : vector<8x1xi32> to vector<8x256xi32>
      %23 = arith.subi %21, %22 : vector<8x256xi32>
      %c0_9 = arith.constant 0 : index
      %c0_10 = arith.constant 0 : index
      %24 = vector.load %arg2[%c0_9, %c0_10] : memref<9x256xf32, #tpu.memory_space<vmem>>, vector<1x256xf32>
      %25 = vector.shape_cast %24 : vector<1x256xf32> to vector<1x256xf32>
      %26 = vector.broadcast %25 : vector<1x256xf32> to vector<8x256xf32>
      %c1_i32 = arith.constant 1 : i32
      %27 = vector.broadcast %c1_i32 : i32 to vector<8x256xi32>
      %28 = arith.cmpi sge, %23, %27 : vector<8x256xi32>
      %c1 = arith.constant 1 : index
      %c0_11 = arith.constant 0 : index
      %29 = vector.load %arg2[%c1, %c0_11] : memref<9x256xf32, #tpu.memory_space<vmem>>, vector<1x256xf32>
      %30 = vector.shape_cast %29 : vector<1x256xf32> to vector<1x256xf32>
      %31 = vector.broadcast %30 : vector<1x256xf32> to vector<8x256xf32>
      %32 = arith.select %28, %31, %26 : vector<8x256xi1>, vector<8x256xf32>
      %c2_i32 = arith.constant 2 : i32
      %33 = vector.broadcast %c2_i32 : i32 to vector<8x256xi32>
      %34 = arith.cmpi sge, %23, %33 : vector<8x256xi32>
      %c2 = arith.constant 2 : index
      %c0_12 = arith.constant 0 : index
      %35 = vector.load %arg2[%c2, %c0_12] : memref<9x256xf32, #tpu.memory_space<vmem>>, vector<1x256xf32>
      %36 = vector.shape_cast %35 : vector<1x256xf32> to vector<1x256xf32>
      %37 = vector.broadcast %36 : vector<1x256xf32> to vector<8x256xf32>
      %38 = arith.select %34, %37, %32 : vector<8x256xi1>, vector<8x256xf32>
      %c3_i32 = arith.constant 3 : i32
      %39 = vector.broadcast %c3_i32 : i32 to vector<8x256xi32>
      %40 = arith.cmpi sge, %23, %39 : vector<8x256xi32>
      %c3 = arith.constant 3 : index
      %c0_13 = arith.constant 0 : index
      %41 = vector.load %arg2[%c3, %c0_13] : memref<9x256xf32, #tpu.memory_space<vmem>>, vector<1x256xf32>
      %42 = vector.shape_cast %41 : vector<1x256xf32> to vector<1x256xf32>
      %43 = vector.broadcast %42 : vector<1x256xf32> to vector<8x256xf32>
      %44 = arith.select %40, %43, %38 : vector<8x256xi1>, vector<8x256xf32>
      %c4_i32_14 = arith.constant 4 : i32
      %45 = vector.broadcast %c4_i32_14 : i32 to vector<8x256xi32>
      %46 = arith.cmpi sge, %23, %45 : vector<8x256xi32>
      %c4 = arith.constant 4 : index
      %c0_15 = arith.constant 0 : index
      %47 = vector.load %arg2[%c4, %c0_15] : memref<9x256xf32, #tpu.memory_space<vmem>>, vector<1x256xf32>
      %48 = vector.shape_cast %47 : vector<1x256xf32> to vector<1x256xf32>
      %49 = vector.broadcast %48 : vector<1x256xf32> to vector<8x256xf32>
      %50 = arith.select %46, %49, %44 : vector<8x256xi1>, vector<8x256xf32>
      %c5_i32 = arith.constant 5 : i32
      %51 = vector.broadcast %c5_i32 : i32 to vector<8x256xi32>
      %52 = arith.cmpi sge, %23, %51 : vector<8x256xi32>
      %c5 = arith.constant 5 : index
      %c0_16 = arith.constant 0 : index
      %53 = vector.load %arg2[%c5, %c0_16] : memref<9x256xf32, #tpu.memory_space<vmem>>, vector<1x256xf32>
      %54 = vector.shape_cast %53 : vector<1x256xf32> to vector<1x256xf32>
      %55 = vector.broadcast %54 : vector<1x256xf32> to vector<8x256xf32>
      %56 = arith.select %52, %55, %50 : vector<8x256xi1>, vector<8x256xf32>
      %c6_i32 = arith.constant 6 : i32
      %57 = vector.broadcast %c6_i32 : i32 to vector<8x256xi32>
      %58 = arith.cmpi sge, %23, %57 : vector<8x256xi32>
      %c6 = arith.constant 6 : index
      %c0_17 = arith.constant 0 : index
      %59 = vector.load %arg2[%c6, %c0_17] : memref<9x256xf32, #tpu.memory_space<vmem>>, vector<1x256xf32>
      %60 = vector.shape_cast %59 : vector<1x256xf32> to vector<1x256xf32>
      %61 = vector.broadcast %60 : vector<1x256xf32> to vector<8x256xf32>
      %62 = arith.select %58, %61, %56 : vector<8x256xi1>, vector<8x256xf32>
      %c7_i32_18 = arith.constant 7 : i32
      %63 = vector.broadcast %c7_i32_18 : i32 to vector<8x256xi32>
      %64 = arith.cmpi sge, %23, %63 : vector<8x256xi32>
      %c7 = arith.constant 7 : index
      %c0_19 = arith.constant 0 : index
      %65 = vector.load %arg2[%c7, %c0_19] : memref<9x256xf32, #tpu.memory_space<vmem>>, vector<1x256xf32>
      %66 = vector.shape_cast %65 : vector<1x256xf32> to vector<1x256xf32>
      %67 = vector.broadcast %66 : vector<1x256xf32> to vector<8x256xf32>
      %68 = arith.select %64, %67, %62 : vector<8x256xi1>, vector<8x256xf32>
      %c8_i32_20 = arith.constant 8 : i32
      %69 = vector.broadcast %c8_i32_20 : i32 to vector<8x256xi32>
      %70 = arith.cmpi sge, %23, %69 : vector<8x256xi32>
      %c8 = arith.constant 8 : index
      %c0_21 = arith.constant 0 : index
      %71 = vector.load %arg2[%c8, %c0_21] : memref<9x256xf32, #tpu.memory_space<vmem>>, vector<1x256xf32>
      %72 = vector.shape_cast %71 : vector<1x256xf32> to vector<1x256xf32>
      %73 = vector.broadcast %72 : vector<1x256xf32> to vector<8x256xf32>
      %74 = arith.select %70, %73, %68 : vector<8x256xi1>, vector<8x256xf32>
      %c0_22 = arith.constant 0 : index
      %c0_23 = arith.constant 0 : index
      %75 = vector.load %arg4[%c0_22, %c0_23] : memref<8x256xf32, #tpu.memory_space<vmem>>, vector<8x256xf32>
      tpu.vector_store %arg4[%c0_22, %c0_23], %74 {strides = array<i32>} : memref<8x256xf32, #tpu.memory_space<vmem>>, vector<8x256xf32>,
    } else {
    }
    return
  }
  func.func @transform_0(%arg0: i32, %arg1: i32) -> (i32, i32) {
    %c0_i32 = arith.constant 0 : i32
    %c0_i32_0 = arith.constant 0 : i32
    %c0_i32_1 = arith.constant 0 : i32
    return %c0_i32, %c0_i32_0 : i32, i32
  }
  func.func @transform_1(%arg0: i32, %arg1: i32) -> (i32, i32) {
    %c0_i32 = arith.constant 0 : i32
    %c0_i32_0 = arith.constant 0 : i32
    %c0_i32_1 = arith.constant 0 : i32
    return %c0_i32, %c0_i32_0 : i32, i32
  }
  func.func @transform_2(%arg0: i32, %arg1: i32) -> (i32, i32) {
    %c0_i32 = arith.constant 0 : i32
    return %arg0, %arg1 : i32, i32
  }
}

</mosaic_0001>

<bundles_post_ra>
// kernel: tpu_custom_call.1
= control target key start
LH: loop header
LB: loop body
LE: loop exit
PB: predicated region body
PF: predicated region fallthrough
CT: control target
= control target key end

     0   :  { %7 = vsyncpa [#allocation3], 0  ;;  %s317_s0 = inlined_call_operand.hbm [shape: f32[9,256], index: 0, kind: input, shape index: {}]   ;;  %s318_s1 = inlined_call_operand.hbm [shape: s32[1,256], index: 1, kind: input, shape index: {}]   ;;  %s319_s2 = inlined_call_operand.hbm [shape: f32[8,256], index: 2, kind: output, shape index: {}]  }
   0x1   :  { %8 = vsyncpa [#allocation6], 0 }
   0x2   :  { %9 = vsyncpa [#allocation4], 0  ;;  %s14_s11 = sshll.u32 %s317_s0, 4  ;;  %s285_s12 = smov [#allocation2]   ;;  %s15_s11 = int_to_ptr.hbm [resolvable:$true] %s14_s11 }
   0x3   :  { %s16_s13 = sshll.u32 %s285_s12, 4  ;;  %s28_s16 = sshll.u32 %s318_s1, 4  ;;  %s17_s13 = int_to_ptr.vmem [resolvable:$true] %s16_s13  ;;  %s29_s16 = int_to_ptr.hbm [resolvable:$true] %s28_s16 }
   0x4   :  { %s286_s17 = smov 256   ;;  %s287_s18 = smov 16  }
   0x5   :  { %22 = dma.hbm_to_vmem [thread:$0]  %s15_s11, 512, %s17_s13, [#allocation3], %s286_s17, %s286_s17, %s287_s18  }
   0x6   :  { %s288_s19 = smov [#allocation5]  }
   0x7   :  { %s30_s20 = sshll.u32 %s288_s19, 4  ;;  %s31_s20 = int_to_ptr.vmem [resolvable:$true] %s30_s20 }
   0x8   :  { %33 = dma.hbm_to_vmem [thread:$0]  %s29_s16, 32, %s31_s20, [#allocation6]  }
   0x9   :  { %279 = dma.done.wait [#allocation3], 512  }
   0xa   :  { %280 = vsyncadd [#allocation3], 4294966784 }
   0xb   :  { %281 = dma.done.wait [#allocation6], 32  }
   0xc   :  { %282 = vsyncadd [#allocation6], 4294967264  ;;  %v79_v0 = vlaneseq  ;;  %v81_v1 = vld [vmem:[#allocation5] sm:$0x3]  ;;  %s289_s0 = smov [#allocation7]   ;;  %s191_s23 = sshll.u32 %s319_s2, 4  ;;  %s192_s23 = int_to_ptr.hbm [resolvable:$true] %s191_s23 }
   0xd   :  { %v88_v2 = vld [vmem:[#allocation2] ss:$8 sm:$0x3]  ;;  %v83_v4 = vadd.s32 4, %v81_v1  ;;  %s189_s1 = sshll.u32 %s289_s0, 4  ;;  %s190_s1 = int_to_ptr.vmem [resolvable:$true] %s189_s1 }
   0xe   :  { %v80_v3 = vshrl.u32 %v79_v0, 7  ;;  %v97_v5 = vld [vmem:[#allocation2 + $0x1] ss:$8 sm:$0x3]  ;;  %v90_v6 = vperm.slane %v88_v2, 0  ;;  %v91_v11 = vperm.slane %v88_v2, 1 }
   0xf   :  { %v108_v7 = vld [vmem:[#allocation2 + $0x2] ss:$8 sm:$0x3]  ;;  %v84_v8 = vperm.slane %v83_v4, 0  ;;  %v85_v10 = vperm.slane %v83_v4, 1  ;;  %v99_v12 = vperm.slane %v97_v5, 0 }
  0x10   :  { %v119_v9 = vld [vmem:[#allocation2 + $0x3] ss:$8 sm:$0x3]  ;;  %v110_v13 = vperm.slane %v108_v7, 0  ;;  %v100_v15 = vperm.slane %v97_v5, 1  ;;  %v111_v19 = vperm.slane %v108_v7, 1 }
  0x11   :  { %v130_v14 = vld [vmem:[#allocation2 + $0x4] ss:$8 sm:$0x3]  ;;  %v86_v16 = vsub.s32 %v84_v8, %v80_v3  ;;  %v121_v17 = vperm.slane %v119_v9, 0  ;;  %v122_v20 = vperm.slane %v119_v9, 1  ;;  %v87_v24 = vsub.s32 %v85_v10, %v80_v3 }
  0x12   :  { %v141_v18 = vld [vmem:[#allocation2 + $0x5] ss:$8 sm:$0x3]  ;;  %v132_v21 = vperm.slane %v130_v14, 0  ;;  %v133_v25 = vperm.slane %v130_v14, 1 }
  0x13   :  { %v143_v22 = vperm.slane %v141_v18, 0  ;;  %v152_v23 = vld [vmem:[#allocation2 + $0x6] ss:$8 sm:$0x3]  ;;  %vm94_vm0 = vcmp.ge.s32.totalorder %v86_v16, 1  ;;  %vm105_vm1 = vcmp.ge.s32.totalorder %v86_v16, 2 }
  0x14   :  { %vm116_vm2 = vcmp.ge.s32.totalorder %v86_v16, 3  ;;  %v144_v26 = vperm.slane %v141_v18, 1  ;;  %v103_v27 = vsel %vm94_vm0, %v99_v12, %v90_v6  ;;  %vm127_vm3 = vcmp.ge.s32.totalorder %v86_v16, 4  ;;  %v163_v28 = vld [vmem:[#allocation2 + $0x7] ss:$8 sm:$0x3] }
  0x15   :  { %vm138_vm4 = vcmp.ge.s32.totalorder %v86_v16, 5  ;;  %vm149_vm5 = vcmp.ge.s32.totalorder %v86_v16, 6  ;;  %v114_v29 = vsel %vm105_vm1, %v110_v13, %v103_v27  ;;  %v154_v30 = vperm.slane %v152_v23, 0  ;;  %v174_v32 = vld [vmem:[#allocation2 + $0x10] ss:$8 sm:$0x3] }
  0x16   :  { %vm160_vm6 = vcmp.ge.s32.totalorder %v86_v16, 7  ;;  %v165_v31 = vperm.slane %v163_v28, 0  ;;  %v125_v33 = vsel %vm116_vm2, %v121_v17, %v114_v29  ;;  %v176_v34 = vperm.slane %v174_v32, 0 }
  0x17   :  { %vm95_vm7 = vcmp.ge.s32.totalorder %v87_v24, 1  ;;  %vm106_vm8 = vcmp.ge.s32.totalorder %v87_v24, 2  ;;  %v136_v35 = vsel %vm127_vm3, %v132_v21, %v125_v33  ;;  %vm117_vm9 = vcmp.ge.s32.totalorder %v87_v24, 3 }
  0x18   :  { %v104_v36 = vsel %vm95_vm7, %v100_v15, %v91_v11  ;;  %vm128_vm10 = vcmp.ge.s32.totalorder %v87_v24, 4  ;;  %v147_v37 = vsel %vm138_vm4, %v143_v22, %v136_v35  ;;  %vm171_vm11 = vcmp.ge.s32.totalorder %v86_v16, 8 }
  0x19   :  { %v115_v38 = vsel %vm106_vm8, %v111_v19, %v104_v36  ;;  %vm139_vm12 = vcmp.ge.s32.totalorder %v87_v24, 5  ;;  %v158_v39 = vsel %vm149_vm5, %v154_v30, %v147_v37  ;;  %vm150_vm13 = vcmp.ge.s32.totalorder %v87_v24, 6 }
  0x1a   :  { %v126_v40 = vsel %vm117_vm9, %v122_v20, %v115_v38  ;;  %v155_v41 = vperm.slane %v152_v23, 1  ;;  %v169_v42 = vsel %vm160_vm6, %v165_v31, %v158_v39  ;;  %vm161_vm14 = vcmp.ge.s32.totalorder %v87_v24, 7 }
  0x1b   :  { %v137_v43 = vsel %vm128_vm10, %v133_v25, %v126_v40  ;;  %v166_v44 = vperm.slane %v163_v28, 1  ;;  %v180_v45 = vsel %vm171_vm11, %v176_v34, %v169_v42  ;;  %vm172_vm15 = vcmp.ge.s32.totalorder %v87_v24, 8 }
  0x1c   :  { %v148_v46 = vsel %vm139_vm12, %v144_v26, %v137_v43  ;;  %v177_v47 = vperm.slane %v174_v32, 1  ;;  %182 = vst [vmem:[#allocation7] sm:$0xff] %v180_v45 }
  0x1d   :  { %v159_v48 = vsel %vm150_vm13, %v155_v41, %v148_v46 }
  0x1e   :  { %v170_v49 = vsel %vm161_vm14, %v166_v44, %v159_v48 }
  0x1f   :  { %v181_v50 = vsel %vm172_vm15, %v177_v47, %v170_v49 }
  0x20   :  { %183 = vst [vmem:[#allocation7 + $0x8] sm:$0xff] %v181_v50 }
  0x21   :  { %194 = dma.vmem_to_hbm [thread:$0]  %s190_s1, 256, %s192_s23, [#allocation4]  }
  0x22   :  { %283 = dma.done.wait [#allocation4], 256  }
  0x23   :  { %284 = vsyncadd [#allocation4], 4294967040 }
  0x24   :  { %199 = vsyncpa [#allocation3], 1 }
  0x25   :  { %200 = vsyncpa [#allocation6], 1 }
  0x26   :  { %201 = vsyncpa [#allocation4], 1 }

</bundles_post_ra>
